<compile_context>
chip_gen: v5e
topology: v5e:2x2
jax: 0.10.0
libtpu: 0.0.40
codegen_flags: <defaults>
</compile_context>

<pallas_src>
import jax
import jax.numpy as jnp
from jax.experimental import pallas as pl
from jax.experimental.pallas import tpu as pltpu


def _round_up(x: int, m: int) -> int:
    return ((x + m - 1) // m) * m


def _cdiv(a: int, b: int) -> int:
    return -(-a // b)


def _silu(x):
    return x * jax.nn.sigmoid(x)


def _vmem_capacity_bytes() -> int:
    """Generation-aware VMEM capacity (128 MiB v5e/v6e, 64 MiB per-TC v7x)."""
    try:
        return int(pltpu.get_tpu_info().vmem_capacity_bytes)
    except Exception:
        return 64 << 20  # conservative fallback (v7x per-TC physical VMEM)


def _balanced_tile(size: int, max_tile: int, mult: int, min_tiles: int = 1):
    """Tile (multiple of `mult`, ~<= max_tile) minimizing padding; >= min_tiles tiles
    when the padded size allows it. Returns (tile, num_tiles, padded_size)."""
    size_r = _round_up(max(size, 1), mult)
    max_tile = max(_round_up(max_tile, mult), mult)
    num = max(_cdiv(size_r, max_tile), 1)
    if min_tiles > 1 and size_r >= min_tiles * mult:
        num = max(num, min_tiles)
    tile = _round_up(_cdiv(size_r, num), mult)
    num = _cdiv(size_r, tile)
    return tile, num, num * tile


# ----------------------------------------------------------------------------- kernels


def mlp_norm_kernel(x_ref, w1_ref, b1_ref, w2_ref, b2_ref, w3_ref, b3_ref, z_ref):
    """Token tile i: 2-block SiLU MLP -> bottleneck, then L2-normalize. z out in fp32."""
    cdt = w1_ref.dtype  # MXU feed dtype (bf16 or fp32); accumulate fp32
    x = x_ref[...]
    h = jnp.dot(x, w1_ref[...], preferred_element_type=jnp.float32)
    h = _silu(h + b1_ref[...])
    h = jnp.dot(h.astype(cdt), w2_ref[...], preferred_element_type=jnp.float32)
    h = _silu(h + b2_ref[...])
    z = jnp.dot(h.astype(cdt), w3_ref[...], preferred_element_type=jnp.float32)
    z = z + b3_ref[...]
    # torch F.normalize(p=2, dim=-1, eps=1e-12) == z / max(||z||, eps)
    ssq = jnp.sum(z * z, axis=-1, keepdims=True)
    z_ref[...] = (z * jax.lax.rsqrt(jnp.maximum(ssq, 1e-24))).astype(z_ref.dtype)


def wn_linear_kernel(z_ref, v_ref, invn_ref, bl_ref, o_ref):
    """Grid (j, i): out tile = (z_i @ V_j) * (1/||V_col||)_j + b_j. V_j resident over i."""
    z = z_ref[...].astype(v_ref.dtype)
    out = jnp.dot(z, v_ref[...], preferred_element_type=jnp.float32)
    o_ref[...] = (out * invn_ref[...] + bl_ref[...]).astype(o_ref.dtype)


# ----------------------------------------------------------------------------- params


def _trunc_normal(key, shape, std=0.02):
    # torch trunc_normal_ truncates at +/- 2*std
    return std * jax.random.truncated_normal(key, -2.0, 2.0, shape, jnp.float32)


def init_dino_head_params(key, inpt_dim, outp_dim, bottleneck_dim=0):
    """Raw (torch-equivalent) parameters. Linear weights stored (in_dim, out_dim)."""
    bottleneck_dim = bottleneck_dim or inpt_dim // 2
    hddn_dim = inpt_dim
    k1, k2, k3, k4, k5 = jax.random.split(key, 5)
    w1 = _trunc_normal(k1, (inpt_dim, hddn_dim))
    b1 = jnp.zeros((hddn_dim,), jnp.float32)
    w2 = _trunc_normal(k2, (hddn_dim, hddn_dim))
    b2 = jnp.zeros((hddn_dim,), jnp.float32)
    w3 = _trunc_normal(k3, (hddn_dim, bottleneck_dim))
    b3 = jnp.zeros((bottleneck_dim,), jnp.float32)
    # last_layer weight-norm direction V, pre-transposed: (bottleneck, outp)
    vt_last = _trunc_normal(k4, (bottleneck_dim, outp_dim), std=0.05)
    lim = 1.0 / (bottleneck_dim ** 0.5)
    b_last = jax.random.uniform(k5, (outp_dim,), jnp.float32, -lim, lim)
    return (w1, b1, w2, b2, w3, b3, vt_last, b_last)


def prepare_dino_head_params(params, *, compute_dtype=jnp.bfloat16, nout_tile_max=2048):
    """One-time prep (hoisted out of the forward path): cast weights to the MXU dtype,
    pad V / biases along the output axis, and precompute 1/||V_col|| (weight_norm g=1)."""
    w1, b1, w2, b2, w3, b3, vt_last, b_last = params
    cdt = jnp.dtype(compute_dtype)
    inpt_dim, hddn_dim = w1.shape
    bneck_dim = w3.shape[1]
    outp_dim = vt_last.shape[1]

    nout_tile, num_j, outp_pad = _balanced_tile(outp_dim, nout_tile_max, 128)
    pad_o = outp_pad - outp_dim

    v_f32 = vt_last.astype(jnp.float32)
    col_norm = jnp.sqrt(jnp.sum(v_f32 * v_f32, axis=0, keepdims=True))  # (1, outp)
    inv_norm = jnp.where(col_norm > 0, 1.0 / col_norm, 0.0)

    return dict(
        w1=w1.astype(cdt), b1=b1.astype(jnp.float32).reshape(1, -1),
        w2=w2.astype(cdt), b2=b2.astype(jnp.float32).reshape(1, -1),
        w3=w3.astype(cdt), b3=b3.astype(jnp.float32).reshape(1, -1),
        v=jnp.pad(vt_last.astype(cdt), ((0, 0), (0, pad_o))),
        inv_norm=jnp.pad(inv_norm, ((0, 0), (0, pad_o))),
        b_last=jnp.pad(b_last.astype(jnp.float32).reshape(1, -1), ((0, 0), (0, pad_o))),
        inpt_dim=inpt_dim, hddn_dim=hddn_dim, bneck_dim=bneck_dim,
        outp_dim=outp_dim, outp_pad=outp_pad, nout_tile=nout_tile, num_j=num_j,
        compute_dtype=cdt,
    )


# ----------------------------------------------------------------------------- forward


def dino_head_forward(x, prepared, *, out_dtype=jnp.bfloat16, n_tile_max=512,
                      min_token_tiles=2, single_buffer_weights=True):
    """x: (..., inpt_dim) -> (..., outp_dim) in out_dtype. `prepared` from
    prepare_dino_head_params(). Leading dims are flattened (glue)."""
    p = prepared
    cdt = p["compute_dtype"]
    cd_b = cdt.itemsize
    out_dtype = jnp.dtype(out_dtype)
    out_b = out_dtype.itemsize
    inpt_dim, hddn_dim = p["inpt_dim"], p["hddn_dim"]
    bneck_dim, outp_dim = p["bneck_dim"], p["outp_dim"]
    outp_pad, nout_tile, num_j = p["outp_pad"], p["nout_tile"], p["num_j"]

    lead = x.shape[:-1]
    x2d = x.reshape(-1, inpt_dim)
    n = x2d.shape[0]

    # Token tiling: sublane multiple per dtype (16 rows for bf16, 8 for fp32),
    # balanced to minimize padding, >= 2 tiles when possible (v7x megacore).
    mult = max(8, 32 // cd_b)
    n_tile, num_i, n_pad = _balanced_tile(n, n_tile_max, mult, min_tiles=min_token_tiles)
    x_p = jnp.pad(x2d.astype(cdt), ((0, n_pad - n), (0, 0)))

    cap = _vmem_capacity_bytes()
    vmem_cap = int(cap * 0.9)

    # ---------------- kernel A: MLP + L2-normalize -> z (n_pad, bneck) fp32 ----------
    w_elems = inpt_dim * hddn_dim + hddn_dim * hddn_dim + hddn_dim * bneck_dim
    flops_a = 2 * n_pad * w_elems
    trans_a = 2 * n_pad * hddn_dim
    bytes_a = int(n_pad * inpt_dim * cd_b + w_elems * cd_b
                  + (2 * hddn_dim + bneck_dim) * 4 + n_pad * bneck_dim * 4)

    def mlp_call(single_buffer: bool):
        wbuf = 1 if single_buffer else 2
        need_a = (2 * n_tile * inpt_dim * cd_b                 # x tile (double-buffered)
                  + wbuf * w_elems * cd_b                      # resident weights
                  + wbuf * (2 * hddn_dim + bneck_dim) * 4      # resident biases
                  + 2 * n_tile * bneck_dim * 4                 # z out tile
                  + 4 * n_tile * hddn_dim * 4)                 # fp32 activation temps
        vmem_a = int(min(max(need_a, 32 << 20), vmem_cap))
        res_kw = {"pipeline_mode": pl.Buffered(1)} if single_buffer else {}
        in_specs = [
            pl.BlockSpec((n_tile, inpt_dim), lambda i: (i, 0)),             # x tile
            pl.BlockSpec((inpt_dim, hddn_dim), lambda i: (0, 0), **res_kw), # w1 resident
            pl.BlockSpec((1, hddn_dim), lambda i: (0, 0), **res_kw),        # b1
            pl.BlockSpec((hddn_dim, hddn_dim), lambda i: (0, 0), **res_kw), # w2 resident
            pl.BlockSpec((1, hddn_dim), lambda i: (0, 0), **res_kw),        # b2
            pl.BlockSpec((hddn_dim, bneck_dim), lambda i: (0, 0), **res_kw),# w3 resident
            pl.BlockSpec((1, bneck_dim), lambda i: (0, 0), **res_kw),       # b3
        ]
        return pl.pallas_call(
            mlp_norm_kernel,
            out_shape=jax.ShapeDtypeStruct((n_pad, bneck_dim), jnp.float32),
            grid_spec=pltpu.PrefetchScalarGridSpec(
                num_scalar_prefetch=0, grid=(num_i,),
                in_specs=in_specs,
                out_specs=pl.BlockSpec((n_tile, bneck_dim), lambda i: (i, 0))),
            compiler_params=pltpu.CompilerParams(
                dimension_semantics=("parallel",), vmem_limit_bytes=vmem_a),
            cost_estimate=pl.CostEstimate(flops=flops_a, transcendentals=trans_a,
                                          bytes_accessed=bytes_a),
        )(x_p, p["w1"], p["b1"], p["w2"], p["b2"], p["w3"], p["b3"])

    if single_buffer_weights:
        try:
            z_p = mlp_call(True)
        except Exception:
            # pl.Buffered(1) not accepted by this JAX/Mosaic version -> default buffering
            z_p = mlp_call(False)
    else:
        z_p = mlp_call(False)

    # ---------------- kernel B: weight-normalized linear (V streamed once) -----------
    flops_b = 2 * n_pad * bneck_dim * outp_pad
    bytes_b = int(bneck_dim * outp_pad * cd_b + num_j * n_pad * bneck_dim * 4
                  + n_pad * outp_pad * out_b + 2 * outp_pad * 4)
    need_b = (2 * n_tile * bneck_dim * 4                        # z tile
              + 2 * bneck_dim * nout_tile * cd_b                # V tile
              + 4 * nout_tile * 4                               # inv_norm + b_last
              + 2 * n_tile * nout_tile * out_b                  # out tile
              + 2 * n_tile * nout_tile * 4)                     # fp32 accumulate temp
    vmem_b = int(min(max(need_b, 32 << 20), vmem_cap))

    out_p = pl.pallas_call(
        wn_linear_kernel,
        out_shape=jax.ShapeDtypeStruct((n_pad, outp_pad), out_dtype),
        grid_spec=pltpu.PrefetchScalarGridSpec(
            num_scalar_prefetch=0,
            grid=(num_j, num_i),  # j OUTER: V column tile stays resident over the i sweep
            in_specs=[
                pl.BlockSpec((n_tile, bneck_dim), lambda j, i: (i, 0)),   # z tile
                pl.BlockSpec((bneck_dim, nout_tile), lambda j, i: (0, j)),# V tile
                pl.BlockSpec((1, nout_tile), lambda j, i: (0, j)),        # 1/||V_col||
                pl.BlockSpec((1, nout_tile), lambda j, i: (0, j)),        # b_last
            ],
            out_specs=pl.BlockSpec((n_tile, nout_tile), lambda j, i: (i, j))),
        compiler_params=pltpu.CompilerParams(
            dimension_semantics=("parallel", "parallel"), vmem_limit_bytes=vmem_b),
        cost_estimate=pl.CostEstimate(flops=flops_b, transcendentals=0,
                                      bytes_accessed=bytes_b),
    )(z_p, p["v"], p["inv_norm"], p["b_last"])

    return out_p[:n, :outp_dim].reshape(*lead, outp_dim)


# ----------------------------------------------------------------------------- reference


def dino_head_reference(x, params):
    """Pure-JAX fp32 reference for correctness checking."""
    w1, b1, w2, b2, w3, b3, vt_last, b_last = params
    h = _silu(x @ w1 + b1)
    h = _silu(h @ w2 + b2)
    z = h @ w3 + b3
    nrm = jnp.sqrt(jnp.sum(z * z, axis=-1, keepdims=True))
    z = z / jnp.maximum(nrm, 1e-12)
    w_hat = vt_last / jnp.sqrt(jnp.sum(vt_last ** 2, axis=0, keepdims=True))
    return z @ w_hat + b_last


if __name__ == "__main__":
    key = jax.random.PRNGKey(0)
    k_x1, k_p1, k_x2, k_p2 = jax.random.split(key, 4)

    # --- Test 1: fp32 MXU + fp32 output, tight tolerance, 2 token tiles (megacore path)
    B, S, INPT, OUTP = 2, 8, 32, 64           # bottleneck = 16, n = 16 tokens
    x1 = jax.random.normal(k_x1, (B, S, INPT), jnp.float32)
    raw1 = init_dino_head_params(k_p1, INPT, OUTP)
    prep1 = prepare_dino_head_params(raw1, compute_dtype=jnp.float32)
    out1 = jax.block_until_ready(dino_head_forward(x1, prep1, out_dtype=jnp.float32))
    ref1 = dino_head_reference(x1, raw1)
    assert out1.shape == (B, S, OUTP), out1.shape
    err1 = float(jnp.max(jnp.abs(out1 - ref1)))
    assert jnp.allclose(out1, ref1, atol=1e-4, rtol=1e-4), err1

    # --- Test 2: bf16 MXU + bf16 output (perf default), ragged tokens, multi j tiles
    B2, S2, INPT2, OUTP2 = 3, 5, 32, 384      # 15 tokens -> padded to 16; 3 output tiles
    x2 = jax.random.normal(k_x2, (B2, S2, INPT2), jnp.float32)
    raw2 = init_dino_head_params(k_p2, INPT2, OUTP2)
    prep2 = prepare_dino_head_params(raw2, compute_dtype=jnp.bfloat16, nout_tile_max=128)
    out2 = jax.block_until_ready(dino_head_forward(x2, prep2, n_tile_max=16))
    ref2 = dino_head_reference(x2, raw2)
    assert out2.shape == (B2, S2, OUTP2), out2.shape
    assert out2.dtype == jnp.bfloat16, out2.dtype
    err2 = float(jnp.max(jnp.abs(out2.astype(jnp.float32) - ref2)))
    assert err2 < 3e-2, err2

    print("KERNEL_OK")
</pallas_src>

<mosaic_0001>
module attributes {stable_mosaic.version = 11 : i64} {
  func.func @mlp_norm_kernel(%arg0: i32, %arg1: memref<8x32xf32, #tpu.memory_space<vmem>>, %arg2: memref<32x32xf32, #tpu.memory_space<vmem>>, %arg3: memref<1x32xf32, #tpu.memory_space<vmem>>, %arg4: memref<32x32xf32, #tpu.memory_space<vmem>>, %arg5: memref<1x32xf32, #tpu.memory_space<vmem>>, %arg6: memref<32x16xf32, #tpu.memory_space<vmem>>, %arg7: memref<1x16xf32, #tpu.memory_space<vmem>>, %arg8: memref<8x16xf32, #tpu.memory_space<vmem>>) attributes {dimension_semantics = [#tpu.dimension_semantics<parallel>], iteration_bounds = array<i64: 2>, scalar_prefetch = 0 : i64, scratch_operands = 0 : i64, tpu.core_type = #tpu.core_type<tc>, window_params = [{transform_indices = @transform_0, window_bounds = array<i64: 8, 32>}, {pipeline_mode = #tpu.pipeline_mode<synchronous>, transform_indices = @transform_1, window_bounds = array<i64: 32, 32>}, {pipeline_mode = #tpu.pipeline_mode<synchronous>, transform_indices = @transform_2, window_bounds = array<i64: 1, 32>}, {pipeline_mode = #tpu.pipeline_mode<synchronous>, transform_indices = @transform_3, window_bounds = array<i64: 32, 32>}, {pipeline_mode = #tpu.pipeline_mode<synchronous>, transform_indices = @transform_4, window_bounds = array<i64: 1, 32>}, {pipeline_mode = #tpu.pipeline_mode<synchronous>, transform_indices = @transform_5, window_bounds = array<i64: 32, 16>}, {pipeline_mode = #tpu.pipeline_mode<synchronous>, transform_indices = @transform_6, window_bounds = array<i64: 1, 16>}, {transform_indices = @transform_7, window_bounds = array<i64: 8, 16>}]} {
    %c0 = arith.constant 0 : index
    %c0_0 = arith.constant 0 : index
    %0 = vector.load %arg1[%c0, %c0_0] : memref<8x32xf32, #tpu.memory_space<vmem>>, vector<8x32xf32>
    %c0_1 = arith.constant 0 : index
    %c0_2 = arith.constant 0 : index
    %1 = vector.load %arg2[%c0_1, %c0_2] : memref<32x32xf32, #tpu.memory_space<vmem>>, vector<32x32xf32>
    %cst = arith.constant dense<0.000000e+00> : vector<8x32xf32>
    %2 = tpu.matmul %0, %1, %cst {dimension_numbers = #tpu.dot_dimension_numbers<[1], [0], [0], [1], [0, 0, 1, 1], [], []>} : vector<8x32xf32>, vector<32x32xf32>, vector<8x32xf32> -> vector<8x32xf32>
    %c0_3 = arith.constant 0 : index
    %c0_4 = arith.constant 0 : index
    %3 = vector.load %arg3[%c0_3, %c0_4] : memref<1x32xf32, #tpu.memory_space<vmem>>, vector<1x32xf32>
    %4 = vector.broadcast %3 : vector<1x32xf32> to vector<8x32xf32>
    %5 = arith.addf %2, %4 : vector<8x32xf32>
    %6 = arith.negf %5 : vector<8x32xf32>
    %7 = math.exp %6 : vector<8x32xf32>
    %cst_5 = arith.constant 1.000000e+00 : f32
    %8 = vector.broadcast %cst_5 : f32 to vector<8x32xf32>
    %9 = arith.addf %8, %7 : vector<8x32xf32>
    %10 = arith.divf %8, %9 : vector<8x32xf32>
    %11 = arith.mulf %5, %10 : vector<8x32xf32>
    %c0_6 = arith.constant 0 : index
    %c0_7 = arith.constant 0 : index
    %12 = vector.load %arg4[%c0_6, %c0_7] : memref<32x32xf32, #tpu.memory_space<vmem>>, vector<32x32xf32>
    %cst_8 = arith.constant dense<0.000000e+00> : vector<8x32xf32>
    %13 = tpu.matmul %11, %12, %cst_8 {dimension_numbers = #tpu.dot_dimension_numbers<[1], [0], [0], [1], [0, 0, 1, 1], [], []>} : vector<8x32xf32>, vector<32x32xf32>, vector<8x32xf32> -> vector<8x32xf32>
    %c0_9 = arith.constant 0 : index
    %c0_10 = arith.constant 0 : index
    %14 = vector.load %arg5[%c0_9, %c0_10] : memref<1x32xf32, #tpu.memory_space<vmem>>, vector<1x32xf32>
    %15 = vector.broadcast %14 : vector<1x32xf32> to vector<8x32xf32>
    %16 = arith.addf %13, %15 : vector<8x32xf32>
    %17 = arith.negf %16 : vector<8x32xf32>
    %18 = math.exp %17 : vector<8x32xf32>
    %cst_11 = arith.constant 1.000000e+00 : f32
    %19 = vector.broadcast %cst_11 : f32 to vector<8x32xf32>
    %20 = arith.addf %19, %18 : vector<8x32xf32>
    %21 = arith.divf %19, %20 : vector<8x32xf32>
    %22 = arith.mulf %16, %21 : vector<8x32xf32>
    %c0_12 = arith.constant 0 : index
    %c0_13 = arith.constant 0 : index
    %23 = vector.load %arg6[%c0_12, %c0_13] : memref<32x16xf32, #tpu.memory_space<vmem>>, vector<32x16xf32>
    %cst_14 = arith.constant dense<0.000000e+00> : vector<8x16xf32>
    %24 = tpu.matmul %22, %23, %cst_14 {dimension_numbers = #tpu.dot_dimension_numbers<[1], [0], [0], [1], [0, 0, 1, 1], [], []>} : vector<8x32xf32>, vector<32x16xf32>, vector<8x16xf32> -> vector<8x16xf32>
    %c0_15 = arith.constant 0 : index
    %c0_16 = arith.constant 0 : index
    %25 = vector.load %arg7[%c0_15, %c0_16] : memref<1x16xf32, #tpu.memory_space<vmem>>, vector<1x16xf32>
    %26 = vector.broadcast %25 : vector<1x16xf32> to vector<8x16xf32>
    %27 = arith.addf %24, %26 : vector<8x16xf32>
    %28 = arith.mulf %27, %27 : vector<8x16xf32>
    %cst_17 = arith.constant dense<0.000000e+00> : vector<8xf32>
    %29 = vector.multi_reduction <add>, %28, %cst_17 [1] : vector<8x16xf32> to vector<8xf32>
    %30 = vector.shape_cast %29 : vector<8xf32> to vector<8x1xf32>
    %cst_18 = arith.constant 1.000000e-24 : f32
    %31 = vector.broadcast %cst_18 : f32 to vector<8x1xf32>
    %32 = arith.maximumf %30, %31 : vector<8x1xf32>
    %33 = math.rsqrt %32 : vector<8x1xf32>
    %34 = vector.broadcast %33 : vector<8x1xf32> to vector<8x16xf32>
    %35 = arith.mulf %27, %34 : vector<8x16xf32>
    %c0_19 = arith.constant 0 : index
    %c0_20 = arith.constant 0 : index
    %36 = vector.load %arg8[%c0_19, %c0_20] : memref<8x16xf32, #tpu.memory_space<vmem>>, vector<8x16xf32>
    tpu.vector_store %arg8[%c0_19, %c0_20], %35 {strides = array<i32>} : memref<8x16xf32, #tpu.memory_space<vmem>>, vector<8x16xf32>,
    return
  }
  func.func @transform_0(%arg0: i32) -> (i32, i32) {
    %c0_i32 = arith.constant 0 : i32
    %c0_i32_0 = arith.constant 0 : i32
    return %arg0, %c0_i32 : i32, i32
  }
  func.func @transform_1(%arg0: i32) -> (i32, i32) {
    %c0_i32 = arith.constant 0 : i32
    %c0_i32_0 = arith.constant 0 : i32
    %c0_i32_1 = arith.constant 0 : i32
    return %c0_i32, %c0_i32_0 : i32, i32
  }
  func.func @transform_2(%arg0: i32) -> (i32, i32) {
    %c0_i32 = arith.constant 0 : i32
    %c0_i32_0 = arith.constant 0 : i32
    %c0_i32_1 = arith.constant 0 : i32
    return %c0_i32, %c0_i32_0 : i32, i32
  }
  func.func @transform_3(%arg0: i32) -> (i32, i32) {
    %c0_i32 = arith.constant 0 : i32
    %c0_i32_0 = arith.constant 0 : i32
    %c0_i32_1 = arith.constant 0 : i32
    return %c0_i32, %c0_i32_0 : i32, i32
  }
  func.func @transform_4(%arg0: i32) -> (i32, i32) {
    %c0_i32 = arith.constant 0 : i32
    %c0_i32_0 = arith.constant 0 : i32
    %c0_i32_1 = arith.constant 0 : i32
    return %c0_i32, %c0_i32_0 : i32, i32
  }
  func.func @transform_5(%arg0: i32) -> (i32, i32) {
    %c0_i32 = arith.constant 0 : i32
    %c0_i32_0 = arith.constant 0 : i32
    %c0_i32_1 = arith.constant 0 : i32
    return %c0_i32, %c0_i32_0 : i32, i32
  }
  func.func @transform_6(%arg0: i32) -> (i32, i32) {
    %c0_i32 = arith.constant 0 : i32
    %c0_i32_0 = arith.constant 0 : i32
    %c0_i32_1 = arith.constant 0 : i32
    return %c0_i32, %c0_i32_0 : i32, i32
  }
  func.func @transform_7(%arg0: i32) -> (i32, i32) {
    %c0_i32 = arith.constant 0 : i32
    %c0_i32_0 = arith.constant 0 : i32
    return %arg0, %c0_i32 : i32, i32
  }
}

module attributes {stable_mosaic.version = 11 : i64} {
  func.func @mlp_norm_kernel(%arg0: i32, %arg1: memref<8x32xf32, #tpu.memory_space<vmem>>, %arg2: memref<32x32xf32, #tpu.memory_space<vmem>>, %arg3: memref<1x32xf32, #tpu.memory_space<vmem>>, %arg4: memref<32x32xf32, #tpu.memory_space<vmem>>, %arg5: memref<1x32xf32, #tpu.memory_space<vmem>>, %arg6: memref<32x16xf32, #tpu.memory_space<vmem>>, %arg7: memref<1x16xf32, #tpu.memory_space<vmem>>, %arg8: memref<8x16xf32, #tpu.memory_space<vmem>>) attributes {dimension_semantics = [#tpu.dimension_semantics<parallel>], iteration_bounds = array<i64: 2>, scalar_prefetch = 0 : i64, scratch_operands = 0 : i64, tpu.core_type = #tpu.core_type<tc>, window_params = [{transform_indices = @transform_0, window_bounds = array<i64: 8, 32>}, {pipeline_mode = #tpu.pipeline_mode<synchronous>, transform_indices = @transform_1, window_bounds = array<i64: 32, 32>}, {pipeline_mode = #tpu.pipeline_mode<synchronous>, transform_indices = @transform_2, window_bounds = array<i64: 1, 32>}, {pipeline_mode = #tpu.pipeline_mode<synchronous>, transform_indices = @transform_3, window_bounds = array<i64: 32, 32>}, {pipeline_mode = #tpu.pipeline_mode<synchronous>, transform_indices = @transform_4, window_bounds = array<i64: 1, 32>}, {pipeline_mode = #tpu.pipeline_mode<synchronous>, transform_indices = @transform_5, window_bounds = array<i64: 32, 16>}, {pipeline_mode = #tpu.pipeline_mode<synchronous>, transform_indices = @transform_6, window_bounds = array<i64: 1, 16>}, {transform_indices = @transform_7, window_bounds = array<i64: 8, 16>}]} {
    %c0 = arith.constant 0 : index
    %c0_0 = arith.constant 0 : index
    %0 = vector.load %arg1[%c0, %c0_0] : memref<8x32xf32, #tpu.memory_space<vmem>>, vector<8x32xf32>
    %c0_1 = arith.constant 0 : index
    %c0_2 = arith.constant 0 : index
    %1 = vector.load %arg2[%c0_1, %c0_2] : memref<32x32xf32, #tpu.memory_space<vmem>>, vector<32x32xf32>
    %cst = arith.constant dense<0.000000e+00> : vector<8x32xf32>
    %2 = tpu.matmul %0, %1, %cst {dimension_numbers = #tpu.dot_dimension_numbers<[1], [0], [0], [1], [0, 0, 1, 1], [], []>} : vector<8x32xf32>, vector<32x32xf32>, vector<8x32xf32> -> vector<8x32xf32>
    %c0_3 = arith.constant 0 : index
    %c0_4 = arith.constant 0 : index
    %3 = vector.load %arg3[%c0_3, %c0_4] : memref<1x32xf32, #tpu.memory_space<vmem>>, vector<1x32xf32>
    %4 = vector.broadcast %3 : vector<1x32xf32> to vector<8x32xf32>
    %5 = arith.addf %2, %4 : vector<8x32xf32>
    %6 = arith.negf %5 : vector<8x32xf32>
    %7 = math.exp %6 : vector<8x32xf32>
    %cst_5 = arith.constant 1.000000e+00 : f32
    %8 = vector.broadcast %cst_5 : f32 to vector<8x32xf32>
    %9 = arith.addf %8, %7 : vector<8x32xf32>
    %10 = arith.divf %8, %9 : vector<8x32xf32>
    %11 = arith.mulf %5, %10 : vector<8x32xf32>
    %c0_6 = arith.constant 0 : index
    %c0_7 = arith.constant 0 : index
    %12 = vector.load %arg4[%c0_6, %c0_7] : memref<32x32xf32, #tpu.memory_space<vmem>>, vector<32x32xf32>
    %cst_8 = arith.constant dense<0.000000e+00> : vector<8x32xf32>
    %13 = tpu.matmul %11, %12, %cst_8 {dimension_numbers = #tpu.dot_dimension_numbers<[1], [0], [0], [1], [0, 0, 1, 1], [], []>} : vector<8x32xf32>, vector<32x32xf32>, vector<8x32xf32> -> vector<8x32xf32>
    %c0_9 = arith.constant 0 : index
    %c0_10 = arith.constant 0 : index
    %14 = vector.load %arg5[%c0_9, %c0_10] : memref<1x32xf32, #tpu.memory_space<vmem>>, vector<1x32xf32>
    %15 = vector.broadcast %14 : vector<1x32xf32> to vector<8x32xf32>
    %16 = arith.addf %13, %15 : vector<8x32xf32>
    %17 = arith.negf %16 : vector<8x32xf32>
    %18 = math.exp %17 : vector<8x32xf32>
    %cst_11 = arith.constant 1.000000e+00 : f32
    %19 = vector.broadcast %cst_11 : f32 to vector<8x32xf32>
    %20 = arith.addf %19, %18 : vector<8x32xf32>
    %21 = arith.divf %19, %20 : vector<8x32xf32>
    %22 = arith.mulf %16, %21 : vector<8x32xf32>
    %c0_12 = arith.constant 0 : index
    %c0_13 = arith.constant 0 : index
    %23 = vector.load %arg6[%c0_12, %c0_13] : memref<32x16xf32, #tpu.memory_space<vmem>>, vector<32x16xf32>
    %cst_14 = arith.constant dense<0.000000e+00> : vector<8x16xf32>
    %24 = tpu.matmul %22, %23, %cst_14 {dimension_numbers = #tpu.dot_dimension_numbers<[1], [0], [0], [1], [0, 0, 1, 1], [], []>} : vector<8x32xf32>, vector<32x16xf32>, vector<8x16xf32> -> vector<8x16xf32>
    %c0_15 = arith.constant 0 : index
    %c0_16 = arith.constant 0 : index
    %25 = vector.load %arg7[%c0_15, %c0_16] : memref<1x16xf32, #tpu.memory_space<vmem>>, vector<1x16xf32>
    %26 = vector.broadcast %25 : vector<1x16xf32> to vector<8x16xf32>
    %27 = arith.addf %24, %26 : vector<8x16xf32>
    %28 = arith.mulf %27, %27 : vector<8x16xf32>
    %cst_17 = arith.constant dense<0.000000e+00> : vector<8xf32>
    %29 = vector.multi_reduction <add>, %28, %cst_17 [1] : vector<8x16xf32> to vector<8xf32>
    %30 = vector.shape_cast %29 : vector<8xf32> to vector<8x1xf32>
    %cst_18 = arith.constant 1.000000e-24 : f32
    %31 = vector.broadcast %cst_18 : f32 to vector<8x1xf32>
    %32 = arith.maximumf %30, %31 : vector<8x1xf32>
    %33 = math.rsqrt %32 : vector<8x1xf32>
    %34 = vector.broadcast %33 : vector<8x1xf32> to vector<8x16xf32>
    %35 = arith.mulf %27, %34 : vector<8x16xf32>
    %c0_19 = arith.constant 0 : index
    %c0_20 = arith.constant 0 : index
    %36 = vector.load %arg8[%c0_19, %c0_20] : memref<8x16xf32, #tpu.memory_space<vmem>>, vector<8x16xf32>
    tpu.vector_store %arg8[%c0_19, %c0_20], %35 {strides = array<i32>} : memref<8x16xf32, #tpu.memory_space<vmem>>, vector<8x16xf32>,
    return
  }
  func.func @transform_0(%arg0: i32) -> (i32, i32) {
    %c0_i32 = arith.constant 0 : i32
    %c0_i32_0 = arith.constant 0 : i32
    return %arg0, %c0_i32 : i32, i32
  }
  func.func @transform_1(%arg0: i32) -> (i32, i32) {
    %c0_i32 = arith.constant 0 : i32
    %c0_i32_0 = arith.constant 0 : i32
    %c0_i32_1 = arith.constant 0 : i32
    return %c0_i32, %c0_i32_0 : i32, i32
  }
  func.func @transform_2(%arg0: i32) -> (i32, i32) {
    %c0_i32 = arith.constant 0 : i32
    %c0_i32_0 = arith.constant 0 : i32
    %c0_i32_1 = arith.constant 0 : i32
    return %c0_i32, %c0_i32_0 : i32, i32
  }
  func.func @transform_3(%arg0: i32) -> (i32, i32) {
    %c0_i32 = arith.constant 0 : i32
    %c0_i32_0 = arith.constant 0 : i32
    %c0_i32_1 = arith.constant 0 : i32
    return %c0_i32, %c0_i32_0 : i32, i32
  }
  func.func @transform_4(%arg0: i32) -> (i32, i32) {
    %c0_i32 = arith.constant 0 : i32
    %c0_i32_0 = arith.constant 0 : i32
    %c0_i32_1 = arith.constant 0 : i32
    return %c0_i32, %c0_i32_0 : i32, i32
  }
  func.func @transform_5(%arg0: i32) -> (i32, i32) {
    %c0_i32 = arith.constant 0 : i32
    %c0_i32_0 = arith.constant 0 : i32
    %c0_i32_1 = arith.constant 0 : i32
    return %c0_i32, %c0_i32_0 : i32, i32
  }
  func.func @transform_6(%arg0: i32) -> (i32, i32) {
    %c0_i32 = arith.constant 0 : i32
    %c0_i32_0 = arith.constant 0 : i32
    %c0_i32_1 = arith.constant 0 : i32
    return %c0_i32, %c0_i32_0 : i32, i32
  }
  func.func @transform_7(%arg0: i32) -> (i32, i32) {
    %c0_i32 = arith.constant 0 : i32
    %c0_i32_0 = arith.constant 0 : i32
    return %arg0, %c0_i32 : i32, i32
  }
}

</mosaic_0001>

<bundles_post_ra>
// kernel: tpu_custom_call.1
= control target key start
LH: loop header
LB: loop body
LE: loop exit
PB: predicated region body
PF: predicated region fallthrough
CT: control target
= control target key end

     0   :  { %12 = vsyncpa [#allocation3], 0  ;;  %s887_s0 = inlined_call_operand.vmem [shape: f32[16,32], index: 0, kind: input, shape index: {}]   ;;  %s888_s1 = inlined_call_operand.vmem [shape: f32[32,32], index: 1, kind: input, shape index: {}]   ;;  %s889_s2 = inlined_call_operand.vmem [shape: f32[1,32], index: 2, kind: input, shape index: {}]   ;;  %s890_s3 = inlined_call_operand.hbm [shape: f32[32,32], index: 3, kind: input, shape index: {}]   ;;  %s891_s4 = inlined_call_operand.vmem [shape: f32[1,32], index: 4, kind: input, shape index: {}]   ;;  %s892_s5 = inlined_call_operand.vmem [shape: f32[32,16], index: 5, kind: input, shape index: {}]   ;;  %s893_s6 = inlined_call_operand.vmem [shape: f32[1,16], index: 6, kind: input, shape index: {}]   ;;  %s894_s7 = inlined_call_operand.hbm [shape: f32[16,16], index: 7, kind: output, shape index: {}]  }
   0x1   :  { %13 = vsyncpa [#allocation4], 0 }
   0x2   :  { %15 = vsyncpa [#allocation4 + $0x1], 0  ;;  %s754_s24 = smov 0   ;;  %s756_s25 = smov 0  }
   0x3   :  { %s758_s26 = smov 0   ;;  %s760_s27 = smov 0  }
   0x4 LB: > { %s775_s28 = sadd.s32 4294967295, %s709_s27   ;;  %s531_s29 = sadd.s32 4294967294, %s709_s27   ;;  %s709_s27 = sphi %s760_s27, %s900_s27   ;;  %s705_s26 = sphi %s758_s26, %s899_s26   ;;  %s701_s25 = sphi %s756_s25, %s898_s25   ;;  %s697_s24 = sphi %s754_s24, %s897_s24  }
   0x5   : > { %s779_s30 = sadd.s32 1, %s709_s27   ;;  %s180_s8 = sadd.s32 1, %s705_s26 }
   0x6   : > { %s177_s9 = ssub.s32 %s709_s27, %s779_s30  ;;  %p190_p0 = scmp.ne.s32.totalorder %s705_s26, %s701_s25 }
   0x7   : > { %p178_p1 = scmp.eq.s32.totalorder %s177_s9, 0  ;;  %p191_p2 = scmp.eq.s32.totalorder %s775_s28, 1 }
   0x8   : > { %p196_p3 = scmp.ne.s32.totalorder %s701_s25, %s697_s24  ;;  %p197_p4 = scmp.eq.s32.totalorder %s531_s29, 1 }
   0x9   : > { %s790_s10 = scalar_select %p178_p1, %s705_s26, %s180_s8  }
   0xa   : > { %p792_p5 = por %p191_p2, %p190_p0  ;;  %p796_p6 = por %p197_p4, %p196_p3 }
   0xb   : > { %p532_p7 = scmp.ge.s32.totalorder %s709_s27, 1  ;;  %p204_p8 = scmp.lt.s32.totalorder %s709_s27, 3 }
   0xc   : > { %p562_p9 = scmp.eq.s32.totalorder %s775_s28, 0  ;;  %s221_s15 = sshll.u32 %s890_s3, 4  ;;  %s222_s15 = int_to_ptr.hbm [resolvable:$true] %s221_s15 }
   0xd   : > { %p205_p10 = pnand %p532_p7, %p204_p8  ;;  %s711_s16 = smov [#allocation2]  }
   0xe   : > { %s223_s17 = sshll.u32 %s711_s16, 4  ;;  %s712_s18 = smov 128   ;;  %s224_s17 = int_to_ptr.vmem [resolvable:$true] %s223_s17 }
   0xf   : > { %p554_p11 = pneg %p205_p10  ;;  %s713_s19 = smov 8  }
  0x10   : > { %255 = sbr.rel (%p205_p10) target bundleno = 624 (0x270), region = 48 }
  0x11   : > { %p555_p12 = pnand %p562_p9, %p554_p11 }
  0x13   : > { %557 = dma.hbm_to_vmem [thread:$0]  (!%p555_p12), %s222_s15, 512, %s224_s17, [#allocation3], %s712_s18, %s712_s18, %s713_s19  }
  0x15   : > { %688 = dma.done.wait (%p562_p9), [#allocation3], 512  }
  0x16   : > { %690 = vsyncadd (%p562_p9), [#allocation3], 4294966784  ;;  %p287_p13 = scmp.lt.s32.totalorder %s775_s28, 1  ;;  %v295_v0 = vld [vmem:[%s888_s1 + $0x18] sm:$0xff]  ;;  %v294_v1 = vld [vmem:[%s888_s1 + $0x10] sm:$0xff]  ;;  %vm300_vm0 = vcmask 261120  }
  0x17   : > { %316 = vmatpush.msra.mxu0 %v295_v0  ;;  %v293_v2 = vld [vmem:[%s888_s1 + $0x8] sm:$0xff]  ;;  %v292_v3 = vld [vmem:[%s888_s1] sm:$0xff]  ;;  %v347_v5 = vld [vmem:[#allocation2 + $0x18] sm:$0xff]  ;;  %vm427_vm9 = vcmask 130048   ;;  %s284_s19 = sand.u32 1, %s701_s25   ;;  %s663_s18 = scalar_lea.hbm %s894_s7, 16 }
  0x18   : > { %s288_s20 = scalar_select %p287_p13, %s775_s28, 1  ;;  %367 = vmatpush.msra.mxu1 %v347_v5  ;;  %v346_v6 = vld [vmem:[#allocation2 + $0x10] sm:$0xff]  ;;  %v600_v7 = vld [vmem:[%s889_s2] ss:$0 sm:$0xff]  ;;  %v345_v8 = vld [vmem:[#allocation2 + $0x8] sm:$0xff] }
  0x19   : > { %317 = vmatpush.msra.mxu0 %v294_v1  ;;  %v344_v9 = vld [vmem:[#allocation2] sm:$0xff]  ;;  %v398_v26 = vld [vmem:[%s892_s5 + $0x18] sm:$0xff]  ;;  %v397_v27 = vld [vmem:[%s892_s5 + $0x10] sm:$0xff] }
  0x1a   : > { %s538_s21 = sshll.u32 %s288_s20, 3  ;;  %368 = vmatpush.msra.mxu1 %v346_v6  ;;  %418 = vmatpush.msra.mxu2 %v398_v26  ;;  %v601_v28 = vld [vmem:[%s891_s4] ss:$0 sm:$0xff]  ;;  %v396_v29 = vld [vmem:[%s892_s5 + $0x8] sm:$0xff]  ;;  %s537_s20 = sshll.u32 %s284_s19, 3 }
  0x1b   : > { %s290_s16 = scalar_lea.vmem %s887_s0, %s538_s21  ;;  %318 = vmatpush.msra.mxu0 %v293_v2  ;;  %v395_v30 = vld [vmem:[%s892_s5] sm:$0xff]  ;;  %s545_s21 = sshll.u32 %s775_s28, 3 }
  0x1c   : > { %v291_v4 = vld [vmem:[%s290_s16] sm:$0xff]  ;;  %369 = vmatpush.msra.mxu1 %v345_v8  ;;  %419 = vmatpush.msra.mxu2 %v397_v27  ;;  %s455_s29 = scalar_lea.hbm %s894_s7, %s545_s21  ;;  %s286_s8 = scalar_lea.vmem [#allocation5], %s537_s20 }
  0x1d   : > { %319 = vmatpush.msra.mxu0 %v292_v3  ;;  %v602_v47 = vld [vmem:[%s893_s6] ss:$0 sm:$0xff]  ;;  %s457_s9 = sshll.u32 %s286_s8, 4  ;;  %s459_s13 = sshll.u32 %s455_s29, 4  ;;  %s458_s9 = int_to_ptr.vmem [resolvable:$true] %s457_s9  ;;  %s460_s13 = int_to_ptr.hbm [resolvable:$true] %s459_s13 }
  0x1e   : > { %539 = vmatmul.msk.f32.vlgmr.msra.gmra.mxu0 %vm300_vm0, %v291_v4  ;;  %370 = vmatpush.msra.mxu1 %v344_v9  ;;  %s445_s28 = scalar_lea.sflag [#allocation4], %s284_s19  ;;  %s657_s14 = sshra.s32 %s460_s13, 4  ;;  %s658_s14 = int_to_ptr.hbm [resolvable:$true] %s657_s14 }
  0x1f   : > { %420 = vmatpush.msra.mxu2 %v396_v29  ;;  %s659_s15 = scalar_lea.hbm %s658_s14, 8  ;;  %p664_p3 = scmp.lt.s32.totalorder %s658_s14, %s894_s7 }
  0x20   : > { %p660_p0 = scmp.ne.s32.totalorder %s658_s14, %s659_s15  ;;  %p665_p4 = scmp.lt.s32.totalorder %s663_s18, %s659_s15 }
  0x21   : > { %421 = vmatpush.msra.mxu2 %v395_v30 }
  0x22   : > { %p661_p1 = pnand %p660_p0, %p792_p5  ;;  %p666_p7 = por %p665_p4, %p664_p3 }
  0x24   : > { %p662_p2 = pneg %p661_p1 }
  0x26   : > { %p667_p8 = pnand %p666_p7, %p662_p2 }
  0x9b   : > { %v321_v10 = vpop.f32.mrf.mxu0 }
  0x9c   : > { %v322_v11 = vadd.f32 %v600_v7, %v321_v10 }
  0x9e   : > { %v540_v12 = vmul.f32 -1.442695, %v322_v11 }
  0xa0   : > { %603 = vpow2.f32 %v540_v12 }
  0xa6   : > { %v604_v13 = vpop.eup %603 }
  0xa7   : > { %v327_v14 = vadd.f32 1.0, %v604_v13 }
  0xa9   : > { %605 = vrcp.f32 %v327_v14  ;;  %v339_v18 = vand.u32 2147483648, %v327_v14  ;;  %v337_v20 = vand.u32 2147483647, %v327_v14  ;;  %vm333_vm2 = vweird.f32 %v327_v14 }
  0xab   : > { %v340_v22 = vor.u32 1.1754944e-38, %v339_v18  ;;  %vm338_vm4 = vcmp.eq.f32.partialorder %v337_v20, 8.507059e+37 }
  0xaf   : > { %v606_v15 = vpop.eup %605 }
  0xb0   : > { %v329_v16 = vmul.f32 %v606_v15, %v327_v14  ;;  %vm334_vm1 = vweird.f32 %v606_v15 }
  0xb1   : > { %vm335_vm3 = vmor %vm333_vm2, %vm334_vm1 }
  0xb2   : > { %v330_v17 = vsub.f32 1.0, %v329_v16 }
  0xb4   : > { %v331_v19 = vmul.f32 %v606_v15, %v330_v17 }
  0xb6   : > { %v332_v21 = vadd.f32 %v606_v15, %v331_v19 }
  0xb8   : > { %v336_v23 = vsel %vm335_vm3, %v606_v15, %v332_v21 }
  0xb9   : > { %v341_v24 = vsel %vm338_vm4, %v340_v22, %v336_v23 }
  0xba   : > { %v343_v25 = vmul.f32 %v341_v24, %v322_v11 }
  0xbc   : > { %541 = vmatmul.msk.f32.vlgmr.msra.gmra.mxu1 %vm300_vm0, %v343_v25 }
 0x139   : > { %v372_v31 = vpop.f32.mrf.mxu1 }
 0x13a   : > { %v373_v32 = vadd.f32 %v601_v28, %v372_v31 }
 0x13c   : > { %v542_v33 = vmul.f32 -1.442695, %v373_v32 }
 0x13e   : > { %607 = vpow2.f32 %v542_v33 }
 0x144   : > { %v608_v34 = vpop.eup %607 }
 0x145   : > { %v378_v35 = vadd.f32 1.0, %v608_v34 }
 0x147   : > { %609 = vrcp.f32 %v378_v35  ;;  %v390_v39 = vand.u32 2147483648, %v378_v35  ;;  %v388_v41 = vand.u32 2147483647, %v378_v35  ;;  %vm384_vm6 = vweird.f32 %v378_v35 }
 0x149   : > { %v391_v43 = vor.u32 1.1754944e-38, %v390_v39  ;;  %vm389_vm8 = vcmp.eq.f32.partialorder %v388_v41, 8.507059e+37 }
 0x14d   : > { %v610_v36 = vpop.eup %609 }
 0x14e   : > { %v380_v37 = vmul.f32 %v610_v36, %v378_v35  ;;  %vm385_vm5 = vweird.f32 %v610_v36 }
 0x14f   : > { %vm386_vm7 = vmor %vm384_vm6, %vm385_vm5 }
 0x150   : > { %v381_v38 = vsub.f32 1.0, %v380_v37 }
 0x152   : > { %v382_v40 = vmul.f32 %v610_v36, %v381_v38 }
 0x154   : > { %v383_v42 = vadd.f32 %v610_v36, %v382_v40 }
 0x156   : > { %v387_v44 = vsel %vm386_vm7, %v610_v36, %v383_v42 }
 0x157   : > { %v392_v45 = vsel %vm389_vm8, %v391_v43, %v387_v44 }
 0x158   : > { %v394_v46 = vmul.f32 %v392_v45, %v373_v32 }
 0x15a   : > { %543 = vmatmul.msk.f32.vlgmr.msra.gmra.mxu2 %vm300_vm0, %v394_v46 }
 0x1dd   : > { %v423_v48 = vpop.f32.mrf.mxu2 }
 0x1de   : > { %v424_v49 = vadd.f32 %v602_v47, %v423_v48 }
 0x1e0   : > { %v426_v50 = vmul.f32 %v424_v49, %v424_v49 }
 0x1e2   : > { %v428_v51 = vsel %vm427_vm9, %v426_v50, 0.0 }
 0x1e3   : > { %429 = vadd.xlane.f32.xlu0 %v428_v51 }
 0x256   : > { %v430_v52 = vpop.xlane.xlu0 %429 }
 0x257   : > { %v431_v53 = vmax.f32 %v430_v52, 1e-24 }
 0x259   : > { %611 = vrsqrt.f32 %v431_v53  ;;  %vm438_vm11 = vweird.f32 %v431_v53 }
 0x25f   : > { %v612_v54 = vpop.eup %611 }
 0x260   : > { %v433_v55 = vmul.f32 %v612_v54, %v431_v53  ;;  %vm439_vm10 = vweird.f32 %v612_v54 }
 0x261   : > { %vm440_vm12 = vmor %vm438_vm11, %vm439_vm10 }
 0x262   : > { %v434_v56 = vmul.f32 %v612_v54, %v433_v55 }
 0x264   : > { %v435_v57 = vmul.f32 0.5, %v434_v56 }
 0x266   : > { %v436_v58 = vsub.f32 1.5, %v435_v57 }
 0x268   : > { %v437_v59 = vmul.f32 %v612_v54, %v436_v58 }
 0x26a   : > { %v441_v60 = vsel %vm440_vm12, %v612_v54, %v437_v59 }
 0x26b   : > { %v442_v61 = vmul.f32 %v441_v60, %v424_v49 }
 0x26d   : > { %443 = vst.msk [vmem:[%s286_s8] sm:$0xff] %vm427_vm9, %v442_v61 }
 0x26e   : > { %670 = shalt.err (!%p667_p8)
}
 0x26f   : > { %552 = dma.vmem_to_hbm [thread:$0]  (%p792_p5), %s458_s9, 128, %s460_s13, %s445_s28  }
 0x270 PF: > { %p564_p9 = scmp.ge.s32.totalorder %s709_s27, 2  ;;  %s471_s19 = sand.u32 1, %s697_s24  }
 0x271   : > { %s472_s22 = scalar_lea.sflag [#allocation4], %s471_s19 }
 0x272   : > { %p559_p10 = pnand %p564_p9, %p796_p6 }
 0x274   : > { %p560_p11 = pneg %p559_p10 }
 0x276   : > { %692 = dma.done.wait (%p560_p11), %s472_s22, 128  }
 0x277   : > { %694 = vsyncadd (%p560_p11), %s472_s22, 4294967168  ;;  %p18_p12 = scmp.ge.s32.totalorder %s779_s30, 4   ;;  %s897_s24 = smov %s701_s25 }
 0x278   : > { %s898_s25 = smov %s705_s26  ;;  %s899_s26 = smov %s790_s10 }
 0x279   : > { %s900_s27 = smov %s779_s30  ;;  %20 = sbr.rel (!%p18_p12) target bundleno = 4 (0x4), region = 88 }
 0x27e   :  { %478 = vsyncpa [#allocation3], 1 }
 0x27f   :  { %480 = vsyncpa [#allocation3 + $0x1], 1 }
 0x280   :  { %481 = vsyncpa [#allocation4], 1 }
 0x281   :  { %483 = vsyncpa [#allocation4 + $0x1], 1 }

// kernel: tpu_custom_call.1
= control target key start
LH: loop header
LB: loop body
LE: loop exit
PB: predicated region body
PF: predicated region fallthrough
CT: control target
= control target key end

     0   :  { %12 = vsyncpa [#allocation3], 0  ;;  %s887_s0 = inlined_call_operand.vmem [shape: f32[16,32], index: 0, kind: input, shape index: {}]   ;;  %s888_s1 = inlined_call_operand.vmem [shape: f32[32,32], index: 1, kind: input, shape index: {}]   ;;  %s889_s2 = inlined_call_operand.vmem [shape: f32[1,32], index: 2, kind: input, shape index: {}]   ;;  %s890_s3 = inlined_call_operand.hbm [shape: f32[32,32], index: 3, kind: input, shape index: {}]   ;;  %s891_s4 = inlined_call_operand.vmem [shape: f32[1,32], index: 4, kind: input, shape index: {}]   ;;  %s892_s5 = inlined_call_operand.vmem [shape: f32[32,16], index: 5, kind: input, shape index: {}]   ;;  %s893_s6 = inlined_call_operand.vmem [shape: f32[1,16], index: 6, kind: input, shape index: {}]   ;;  %s894_s7 = inlined_call_operand.hbm [shape: f32[16,16], index: 7, kind: output, shape index: {}]  }
   0x1   :  { %13 = vsyncpa [#allocation4], 0 }
   0x2   :  { %15 = vsyncpa [#allocation4 + $0x1], 0  ;;  %s754_s24 = smov 0   ;;  %s756_s25 = smov 0  }
   0x3   :  { %s758_s26 = smov 0   ;;  %s760_s27 = smov 0  }
   0x4 LB: > { %s775_s28 = sadd.s32 4294967295, %s709_s27   ;;  %s531_s29 = sadd.s32 4294967294, %s709_s27   ;;  %s709_s27 = sphi %s760_s27, %s900_s27   ;;  %s705_s26 = sphi %s758_s26, %s899_s26   ;;  %s701_s25 = sphi %s756_s25, %s898_s25   ;;  %s697_s24 = sphi %s754_s24, %s897_s24  }
   0x5   : > { %s779_s30 = sadd.s32 1, %s709_s27   ;;  %s180_s8 = sadd.s32 1, %s705_s26 }
   0x6   : > { %s177_s9 = ssub.s32 %s709_s27, %s779_s30  ;;  %p190_p0 = scmp.ne.s32.totalorder %s705_s26, %s701_s25 }
   0x7   : > { %p178_p1 = scmp.eq.s32.totalorder %s177_s9, 0  ;;  %p191_p2 = scmp.eq.s32.totalorder %s775_s28, 1 }
   0x8   : > { %p196_p3 = scmp.ne.s32.totalorder %s701_s25, %s697_s24  ;;  %p197_p4 = scmp.eq.s32.totalorder %s531_s29, 1 }
   0x9   : > { %s790_s10 = scalar_select %p178_p1, %s705_s26, %s180_s8  }
   0xa   : > { %p792_p5 = por %p191_p2, %p190_p0  ;;  %p796_p6 = por %p197_p4, %p196_p3 }
   0xb   : > { %p532_p7 = scmp.ge.s32.totalorder %s709_s27, 1  ;;  %p204_p8 = scmp.lt.s32.totalorder %s709_s27, 3 }
   0xc   : > { %p562_p9 = scmp.eq.s32.totalorder %s775_s28, 0  ;;  %s221_s15 = sshll.u32 %s890_s3, 4  ;;  %s222_s15 = int_to_ptr.hbm [resolvable:$true] %s221_s15 }
   0xd   : > { %p205_p10 = pnand %p532_p7, %p204_p8  ;;  %s711_s16 = smov [#allocation2]  }
   0xe   : > { %s223_s17 = sshll.u32 %s711_s16, 4  ;;  %s712_s18 = smov 128   ;;  %s224_s17 = int_to_ptr.vmem [resolvable:$true] %s223_s17 }
   0xf   : > { %p554_p11 = pneg %p205_p10  ;;  %s713_s19 = smov 8  }
  0x10   : > { %255 = sbr.rel (%p205_p10) target bundleno = 624 (0x270), region = 48 }
  0x11   : > { %p555_p12 = pnand %p562_p9, %p554_p11 }
  0x13   : > { %557 = dma.hbm_to_vmem [thread:$0]  (!%p555_p12), %s222_s15, 512, %s224_s17, [#allocation3], %s712_s18, %s712_s18, %s713_s19  }
  0x15   : > { %688 = dma.done.wait (%p562_p9), [#allocation3], 512  }
  0x16   : > { %690 = vsyncadd (%p562_p9), [#allocation3], 4294966784  ;;  %p287_p13 = scmp.lt.s32.totalorder %s775_s28, 1  ;;  %v295_v0 = vld [vmem:[%s888_s1 + $0x18] sm:$0xff]  ;;  %v294_v1 = vld [vmem:[%s888_s1 + $0x10] sm:$0xff]  ;;  %vm300_vm0 = vcmask 261120  }
  0x17   : > { %316 = vmatpush.msra.mxu0 %v295_v0  ;;  %v293_v2 = vld [vmem:[%s888_s1 + $0x8] sm:$0xff]  ;;  %v292_v3 = vld [vmem:[%s888_s1] sm:$0xff]  ;;  %v347_v5 = vld [vmem:[#allocation2 + $0x18] sm:$0xff]  ;;  %vm427_vm9 = vcmask 130048   ;;  %s284_s19 = sand.u32 1, %s701_s25   ;;  %s663_s18 = scalar_lea.hbm %s894_s7, 16 }
  0x18   : > { %s288_s20 = scalar_select %p287_p13, %s775_s28, 1  ;;  %367 = vmatpush.msra.mxu1 %v347_v5  ;;  %v346_v6 = vld [vmem:[#allocation2 + $0x10] sm:$0xff]  ;;  %v600_v7 = vld [vmem:[%s889_s2] ss:$0 sm:$0xff]  ;;  %v345_v8 = vld [vmem:[#allocation2 + $0x8] sm:$0xff] }
  0x19   : > { %317 = vmatpush.msra.mxu0 %v294_v1  ;;  %v344_v9 = vld [vmem:[#allocation2] sm:$0xff]  ;;  %v398_v26 = vld [vmem:[%s892_s5 + $0x18] sm:$0xff]  ;;  %v397_v27 = vld [vmem:[%s892_s5 + $0x10] sm:$0xff] }
  0x1a   : > { %s538_s21 = sshll.u32 %s288_s20, 3  ;;  %368 = vmatpush.msra.mxu1 %v346_v6  ;;  %418 = vmatpush.msra.mxu2 %v398_v26  ;;  %v601_v28 = vld [vmem:[%s891_s4] ss:$0 sm:$0xff]  ;;  %v396_v29 = vld [vmem:[%s892_s5 + $0x8] sm:$0xff]  ;;  %s537_s20 = sshll.u32 %s284_s19, 3 }
  0x1b   : > { %s290_s16 = scalar_lea.vmem %s887_s0, %s538_s21  ;;  %318 = vmatpush.msra.mxu0 %v293_v2  ;;  %v395_v30 = vld [vmem:[%s892_s5] sm:$0xff]  ;;  %s545_s21 = sshll.u32 %s775_s28, 3 }
  0x1c   : > { %v291_v4 = vld [vmem:[%s290_s16] sm:$0xff]  ;;  %369 = vmatpush.msra.mxu1 %v345_v8  ;;  %419 = vmatpush.msra.mxu2 %v397_v27  ;;  %s455_s29 = scalar_lea.hbm %s894_s7, %s545_s21  ;;  %s286_s8 = scalar_lea.vmem [#allocation5], %s537_s20 }
  0x1d   : > { %319 = vmatpush.msra.mxu0 %v292_v3  ;;  %v602_v47 = vld [vmem:[%s893_s6] ss:$0 sm:$0xff]  ;;  %s457_s9 = sshll.u32 %s286_s8, 4  ;;  %s459_s13 = sshll.u32 %s455_s29, 4  ;;  %s458_s9 = int_to_ptr.vmem [resolvable:$true] %s457_s9  ;;  %s460_s13 = int_to_ptr.hbm [resolvable:$true] %s459_s13 }
  0x1e   : > { %539 = vmatmul.msk.f32.vlgmr.msra.gmra.mxu0 %vm300_vm0, %v291_v4  ;;  %370 = vmatpush.msra.mxu1 %v344_v9  ;;  %s445_s28 = scalar_lea.sflag [#allocation4], %s284_s19  ;;  %s657_s14 = sshra.s32 %s460_s13, 4  ;;  %s658_s14 = int_to_ptr.hbm [resolvable:$true] %s657_s14 }
  0x1f   : > { %420 = vmatpush.msra.mxu2 %v396_v29  ;;  %s659_s15 = scalar_lea.hbm %s658_s14, 8  ;;  %p664_p3 = scmp.lt.s32.totalorder %s658_s14, %s894_s7 }
  0x20   : > { %p660_p0 = scmp.ne.s32.totalorder %s658_s14, %s659_s15  ;;  %p665_p4 = scmp.lt.s32.totalorder %s663_s18, %s659_s15 }
  0x21   : > { %421 = vmatpush.msra.mxu2 %v395_v30 }
  0x22   : > { %p661_p1 = pnand %p660_p0, %p792_p5  ;;  %p666_p7 = por %p665_p4, %p664_p3 }
  0x24   : > { %p662_p2 = pneg %p661_p1 }
  0x26   : > { %p667_p8 = pnand %p666_p7, %p662_p2 }
  0x9b   : > { %v321_v10 = vpop.f32.mrf.mxu0 }
  0x9c   : > { %v322_v11 = vadd.f32 %v600_v7, %v321_v10 }
  0x9e   : > { %v540_v12 = vmul.f32 -1.442695, %v322_v11 }
  0xa0   : > { %603 = vpow2.f32 %v540_v12 }
  0xa6   : > { %v604_v13 = vpop.eup %603 }
  0xa7   : > { %v327_v14 = vadd.f32 1.0, %v604_v13 }
  0xa9   : > { %605 = vrcp.f32 %v327_v14  ;;  %v339_v18 = vand.u32 2147483648, %v327_v14  ;;  %v337_v20 = vand.u32 2147483647, %v327_v14  ;;  %vm333_vm2 = vweird.f32 %v327_v14 }
  0xab   : > { %v340_v22 = vor.u32 1.1754944e-38, %v339_v18  ;;  %vm338_vm4 = vcmp.eq.f32.partialorder %v337_v20, 8.507059e+37 }
  0xaf   : > { %v606_v15 = vpop.eup %605 }
  0xb0   : > { %v329_v16 = vmul.f32 %v606_v15, %v327_v14  ;;  %vm334_vm1 = vweird.f32 %v606_v15 }
  0xb1   : > { %vm335_vm3 = vmor %vm333_vm2, %vm334_vm1 }
  0xb2   : > { %v330_v17 = vsub.f32 1.0, %v329_v16 }
  0xb4   : > { %v331_v19 = vmul.f32 %v606_v15, %v330_v17 }
  0xb6   : > { %v332_v21 = vadd.f32 %v606_v15, %v331_v19 }
  0xb8   : > { %v336_v23 = vsel %vm335_vm3, %v606_v15, %v332_v21 }
  0xb9   : > { %v341_v24 = vsel %vm338_vm4, %v340_v22, %v336_v23 }
  0xba   : > { %v343_v25 = vmul.f32 %v341_v24, %v322_v11 }
  0xbc   : > { %541 = vmatmul.msk.f32.vlgmr.msra.gmra.mxu1 %vm300_vm0, %v343_v25 }
 0x139   : > { %v372_v31 = vpop.f32.mrf.mxu1 }
 0x13a   : > { %v373_v32 = vadd.f32 %v601_v28, %v372_v31 }
 0x13c   : > { %v542_v33 = vmul.f32 -1.442695, %v373_v32 }
 0x13e   : > { %607 = vpow2.f32 %v542_v33 }
 0x144   : > { %v608_v34 = vpop.eup %607 }
 0x145   : > { %v378_v35 = vadd.f32 1.0, %v608_v34 }
 0x147   : > { %609 = vrcp.f32 %v378_v35  ;;  %v390_v39 = vand.u32 2147483648, %v378_v35  ;;  %v388_v41 = vand.u32 2147483647, %v378_v35  ;;  %vm384_vm6 = vweird.f32 %v378_v35 }
 0x149   : > { %v391_v43 = vor.u32 1.1754944e-38, %v390_v39  ;;  %vm389_vm8 = vcmp.eq.f32.partialorder %v388_v41, 8.507059e+37 }
 0x14d   : > { %v610_v36 = vpop.eup %609 }
 0x14e   : > { %v380_v37 = vmul.f32 %v610_v36, %v378_v35  ;;  %vm385_vm5 = vweird.f32 %v610_v36 }
 0x14f   : > { %vm386_vm7 = vmor %vm384_vm6, %vm385_vm5 }
 0x150   : > { %v381_v38 = vsub.f32 1.0, %v380_v37 }
 0x152   : > { %v382_v40 = vmul.f32 %v610_v36, %v381_v38 }
 0x154   : > { %v383_v42 = vadd.f32 %v610_v36, %v382_v40 }
 0x156   : > { %v387_v44 = vsel %vm386_vm7, %v610_v36, %v383_v42 }
 0x157   : > { %v392_v45 = vsel %vm389_vm8, %v391_v43, %v387_v44 }
 0x158   : > { %v394_v46 = vmul.f32 %v392_v45, %v373_v32 }
 0x15a   : > { %543 = vmatmul.msk.f32.vlgmr.msra.gmra.mxu2 %vm300_vm0, %v394_v46 }
 0x1dd   : > { %v423_v48 = vpop.f32.mrf.mxu2 }
 0x1de   : > { %v424_v49 = vadd.f32 %v602_v47, %v423_v48 }
 0x1e0   : > { %v426_v50 = vmul.f32 %v424_v49, %v424_v49 }
 0x1e2   : > { %v428_v51 = vsel %vm427_vm9, %v426_v50, 0.0 }
 0x1e3   : > { %429 = vadd.xlane.f32.xlu0 %v428_v51 }
 0x256   : > { %v430_v52 = vpop.xlane.xlu0 %429 }
 0x257   : > { %v431_v53 = vmax.f32 %v430_v52, 1e-24 }
 0x259   : > { %611 = vrsqrt.f32 %v431_v53  ;;  %vm438_vm11 = vweird.f32 %v431_v53 }
 0x25f   : > { %v612_v54 = vpop.eup %611 }
 0x260   : > { %v433_v55 = vmul.f32 %v612_v54, %v431_v53  ;;  %vm439_vm10 = vweird.f32 %v612_v54 }
 0x261   : > { %vm440_vm12 = vmor %vm438_vm11, %vm439_vm10 }
 0x262   : > { %v434_v56 = vmul.f32 %v612_v54, %v433_v55 }
 0x264   : > { %v435_v57 = vmul.f32 0.5, %v434_v56 }
 0x266   : > { %v436_v58 = vsub.f32 1.5, %v435_v57 }
 0x268   : > { %v437_v59 = vmul.f32 %v612_v54, %v436_v58 }
 0x26a   : > { %v441_v60 = vsel %vm440_vm12, %v612_v54, %v437_v59 }
 0x26b   : > { %v442_v61 = vmul.f32 %v441_v60, %v424_v49 }
 0x26d   : > { %443 = vst.msk [vmem:[%s286_s8] sm:$0xff] %vm427_vm9, %v442_v61 }
 0x26e   : > { %670 = shalt.err (!%p667_p8)
}
 0x26f   : > { %552 = dma.vmem_to_hbm [thread:$0]  (%p792_p5), %s458_s9, 128, %s460_s13, %s445_s28  }
 0x270 PF: > { %p564_p9 = scmp.ge.s32.totalorder %s709_s27, 2  ;;  %s471_s19 = sand.u32 1, %s697_s24  }
 0x271   : > { %s472_s22 = scalar_lea.sflag [#allocation4], %s471_s19 }
 0x272   : > { %p559_p10 = pnand %p564_p9, %p796_p6 }
 0x274   : > { %p560_p11 = pneg %p559_p10 }
 0x276   : > { %692 = dma.done.wait (%p560_p11), %s472_s22, 128  }
 0x277   : > { %694 = vsyncadd (%p560_p11), %s472_s22, 4294967168  ;;  %p18_p12 = scmp.ge.s32.totalorder %s779_s30, 4   ;;  %s897_s24 = smov %s701_s25 }
 0x278   : > { %s898_s25 = smov %s705_s26  ;;  %s899_s26 = smov %s790_s10 }
 0x279   : > { %s900_s27 = smov %s779_s30  ;;  %20 = sbr.rel (!%p18_p12) target bundleno = 4 (0x4), region = 88 }
 0x27e   :  { %478 = vsyncpa [#allocation3], 1 }
 0x27f   :  { %480 = vsyncpa [#allocation3 + $0x1], 1 }
 0x280   :  { %481 = vsyncpa [#allocation4], 1 }
 0x281   :  { %483 = vsyncpa [#allocation4 + $0x1], 1 }

</bundles_post_ra>
